<compile_context>
chip_gen: v7x
topology: tpu7x:2x2x1
jax: 0.10.0
libtpu: 0.0.40
codegen_flags: <defaults>
</compile_context>

<pallas_src>
import functools

import jax
import jax.numpy as jnp
from jax.experimental import pallas as pl
from jax.experimental.pallas import tpu as pltpu

_PARALLEL_CORES_TARGET = 2   # v7x has 2 TensorCores; extra split is harmless elsewhere


def _generation_budgets():
    """(max_tile_bytes, vmem_limit_bytes), gated on physical VMEM size."""
    vmem = None
    try:
        vmem = getattr(pltpu.get_tpu_info(), "vmem_capacity_bytes", None)
    except Exception:
        vmem = None
    if vmem is None or vmem <= 80 * 1024 * 1024:
        # v7x-class (64 MiB physical VMEM) or unknown generation: conservative.
        return 4 * 1024 * 1024, 40 * 1024 * 1024
    # v5e / v6e: 128 MiB physical VMEM.
    return 8 * 1024 * 1024, 64 * 1024 * 1024


def _pick_hw_tile(n_ch, hw, itemsize, max_tile_bytes):
    """Lane tile for the flattened spatial axis, sized purely by a byte budget:
    multiple of 128 lanes, >=128; the full (exempt) dim when it all fits."""
    lanes = max_tile_bytes // max(1, n_ch * itemsize)
    lanes = max(128, (lanes // 128) * 128)
    return hw if lanes >= hw else lanes


def _pick_parallel_split(n, total_tiles):
    """Split the spatial reduction into parallel chunks so a v7x megacore has
    work on both TensorCores even when N is small."""
    if total_tiles <= 1:
        return 1
    return max(1, min(total_tiles, _PARALLEL_CORES_TARGET // max(1, n)))


def _pool_kernel(x_ref, psum_ref, acc_ref, *, hw, tile_hw, tiles_per_chunk,
                 total_tiles, num_chunks):
    # x_ref: (1, C_in, tile_hw); psum_ref: (1, 1, C_in, 1); acc_ref: (C_in, tile_hw) f32
    p = pl.program_id(1)
    t = pl.program_id(2)
    gt = p * tiles_per_chunk + t          # global tile index along flattened HW

    @pl.when(t == 0)
    def _():
        acc_ref[...] = jnp.zeros_like(acc_ref)

    x = x_ref[0]                          # (C_in, tile_hw)

    def _acc_unmasked():
        acc_ref[...] += x.astype(jnp.float32)

    def _acc_masked():
        lane = gt * tile_hw + jax.lax.broadcasted_iota(jnp.int32, x.shape, 1)
        acc_ref[...] += jnp.where(lane < hw, x, jnp.zeros_like(x)).astype(jnp.float32)

    partial_last = (hw % tile_hw) != 0
    padded_grid = (num_chunks * tiles_per_chunk) > total_tiles

    if not partial_last and not padded_grid:
        # Hot path: every grid step is a full tile -> unconditional dense add.
        _acc_unmasked()
    else:
        last_real = total_tiles - 1
        if partial_last:
            @pl.when(gt < last_real)
            def _():
                _acc_unmasked()

            @pl.when(gt == last_real)
            def _():
                _acc_masked()
        else:
            @pl.when(gt < total_tiles)
            def _():
                _acc_unmasked()
        # gt >= total_tiles (padding steps from the parallel split): no-op.

    @pl.when(t == tiles_per_chunk - 1)
    def _():
        # Single cross-lane (XLU) reduce per (n, chunk).
        psum_ref[0, 0] = jnp.sum(acc_ref[...], axis=1, keepdims=True)


def _broadcast_kernel(y_ref, o_ref):
    # y_ref: (1, C_out, 1) f32; o_ref: (1, C_out, tile_hw)
    c_out, tile = o_ref.shape[1], o_ref.shape[2]
    o_ref[0] = jnp.broadcast_to(y_ref[0], (c_out, tile)).astype(o_ref.dtype)


def image_pool_forward(x, weight, bias, *, max_tile_bytes=None, vmem_limit_bytes=None):
    """x: (N, C_in, H, W) NCHW; weight: (C_out, C_in); bias: (C_out,)."""
    N, C_in, H, W = x.shape
    C_out = weight.shape[0]
    HW = H * W

    default_tile_bytes, default_vmem = _generation_budgets()
    tile_bytes = default_tile_bytes if max_tile_bytes is None else max_tile_bytes
    vmem_bytes = default_vmem if vmem_limit_bytes is None else vmem_limit_bytes

    x_flat = x.reshape(N, C_in, HW)
    itemsize = jnp.dtype(x.dtype).itemsize

    # ---- Pass A: streaming global sum over HW -> per-chunk partials (N, P, C_in, 1).
    in_tile = _pick_hw_tile(C_in, HW, itemsize, tile_bytes)
    total_tiles = pl.cdiv(HW, in_tile)
    num_chunks = _pick_parallel_split(N, total_tiles)
    tiles_per_chunk = pl.cdiv(total_tiles, num_chunks)

    def x_index_map(n, p, t):
        gt = p * tiles_per_chunk + t
        # Padding steps from the parallel split are clamped to a valid block;
        # the kernel skips their contribution.
        return (n, 0, jnp.minimum(gt, total_tiles - 1))

    psum = pl.pallas_call(
        functools.partial(_pool_kernel, hw=HW, tile_hw=in_tile,
                          tiles_per_chunk=tiles_per_chunk,
                          total_tiles=total_tiles, num_chunks=num_chunks),
        out_shape=jax.ShapeDtypeStruct((N, num_chunks, C_in, 1), jnp.float32),
        grid_spec=pltpu.PrefetchScalarGridSpec(
            num_scalar_prefetch=0,
            grid=(N, num_chunks, tiles_per_chunk),
            in_specs=[pl.BlockSpec((1, C_in, in_tile), x_index_map)],
            out_specs=pl.BlockSpec((1, 1, C_in, 1), lambda n, p, t: (n, p, 0, 0)),
            scratch_shapes=[pltpu.VMEM((C_in, in_tile), jnp.float32)],
        ),
        compiler_params=pltpu.CompilerParams(
            dimension_semantics=("parallel", "parallel", "arbitrary"),
            vmem_limit_bytes=vmem_bytes),
    )(x_flat)

    # ---- Tiny combine + 1x1 conv + bias + ReLU in plain JAX (hoisted out of the
    # streaming kernel per perf review; XLA fuses this microscopic matmul).
    pooled = psum.reshape(N, num_chunks, C_in).sum(axis=1) * jnp.float32(1.0 / HW)
    y = pooled @ weight.astype(jnp.float32).T + bias.astype(jnp.float32)[None, :]
    y = jnp.maximum(y, 0.0).reshape(N, C_out, 1)               # (N, C_out, 1) f32

    # ---- Pass B: bilinear upsample from 1x1 == broadcast, streamed in wide,
    # lane-dense tiles; both grid axes parallel (megacore-friendly).
    out_tile = _pick_hw_tile(C_out, HW, itemsize, tile_bytes)
    n_out_tiles = pl.cdiv(HW, out_tile)

    out_flat = pl.pallas_call(
        _broadcast_kernel,
        out_shape=jax.ShapeDtypeStruct((N, C_out, HW), x.dtype),
        grid_spec=pltpu.PrefetchScalarGridSpec(
            num_scalar_prefetch=0,
            grid=(N, n_out_tiles),
            in_specs=[pl.BlockSpec((1, C_out, 1), lambda n, t: (n, 0, 0))],
            out_specs=pl.BlockSpec((1, C_out, out_tile), lambda n, t: (n, 0, t)),
        ),
        compiler_params=pltpu.CompilerParams(
            dimension_semantics=("parallel", "parallel"),
            vmem_limit_bytes=vmem_bytes),
    )(y)

    return out_flat.reshape(N, C_out, H, W)


def _reference(x, weight, bias):
    # Pure-JAX reference of the PyTorch forward.
    pooled = jnp.mean(x.astype(jnp.float32), axis=(2, 3))      # (N, C_in)
    y = pooled @ weight.astype(jnp.float32).T + bias.astype(jnp.float32)[None, :]
    y = jnp.maximum(y, 0.0)
    H, W = x.shape[2], x.shape[3]
    return jnp.broadcast_to(y[:, :, None, None],
                            (x.shape[0], weight.shape[0], H, W)).astype(x.dtype)


if __name__ == "__main__":
    key = jax.random.PRNGKey(0)
    k_x, k_w, k_b, k_x2, k_x3 = jax.random.split(key, 5)

    # Case 1: small f32 case (single full-dim HW tile path).
    N, C_in, C_out, H, W = 2, 4, 8, 16, 16
    x = jax.random.normal(k_x, (N, C_in, H, W), dtype=jnp.float32)
    bound = 1.0 / (C_in ** 0.5)
    weight = jax.random.uniform(k_w, (C_out, C_in), jnp.float32, -bound, bound)
    bias = jax.random.uniform(k_b, (C_out,), jnp.float32, -bound, bound)

    out = jax.block_until_ready(image_pool_forward(x, weight, bias))
    ref = _reference(x, weight, bias)
    assert out.shape == (N, C_out, H, W)
    assert jnp.allclose(out, ref, atol=1e-5, rtol=1e-5), "mismatch vs reference (case 1)"

    # Case 2: exercises the multi-tile, masked-last-tile and parallel-split
    # (megacore) paths by forcing a tiny per-buffer byte budget.  HW = 2209.
    H2, W2 = 47, 47
    x2 = jax.random.normal(k_x2, (1, C_in, H2, W2), dtype=jnp.float32)
    out2 = jax.block_until_ready(
        image_pool_forward(x2, weight, bias, max_tile_bytes=4096))
    ref2 = _reference(x2, weight, bias)
    assert out2.shape == (1, C_out, H2, W2)
    assert jnp.allclose(out2, ref2, atol=1e-5, rtol=1e-5), "mismatch vs reference (case 2)"

    # Case 3: bf16 inputs/weights (halved HBM traffic; f32 accumulation inside).
    xb = jax.random.normal(k_x3, (N, C_in, H, W), dtype=jnp.bfloat16)
    wb = weight.astype(jnp.bfloat16)
    bb = bias.astype(jnp.bfloat16)
    out3 = jax.block_until_ready(image_pool_forward(xb, wb, bb))
    ref3 = _reference(xb, wb, bb)
    assert out3.shape == (N, C_out, H, W)
    assert jnp.allclose(out3.astype(jnp.float32), ref3.astype(jnp.float32),
                        atol=2e-2, rtol=2e-2), "mismatch vs reference (case 3)"

    print("KERNEL_OK")
</pallas_src>

<mosaic_0001>
module attributes {stable_mosaic.version = 11 : i64} {
  func.func @_pool_kernel(%arg0: i32, %arg1: i32, %arg2: i32, %arg3: memref<1x4x256xf32, #tpu.memory_space<vmem>>, %arg4: memref<1x1x4x1xf32, #tpu.memory_space<vmem>>, %arg5: memref<4x256xf32, #tpu.memory_space<vmem>>) attributes {dimension_semantics = [#tpu.dimension_semantics<parallel>, #tpu.dimension_semantics<parallel>, #tpu.dimension_semantics<arbitrary>], iteration_bounds = array<i64: 2, 1, 1>, scalar_prefetch = 0 : i64, scratch_operands = 1 : i64, tpu.core_type = #tpu.core_type<tc>, window_params = [{transform_indices = @transform_0, window_bounds = array<i64: 1, 4, 256>}, {transform_indices = @transform_1, window_bounds = array<i64: 1, 1, 4, 1>}]} {
    %c0_i32 = arith.constant 0 : i32
    %0 = arith.cmpi eq, %arg2, %c0_i32 : i32
    %1 = arith.extui %0 : i1 to i32
    %c0_i32_0 = arith.constant 0 : i32
    %2 = arith.cmpi ne, %1, %c0_i32_0 : i32
    scf.if %2 {
      %cst = arith.constant 0.000000e+00 : f32
      %11 = vector.broadcast %cst : f32 to vector<4x256xf32>
      %c0_9 = arith.constant 0 : index
      %c0_10 = arith.constant 0 : index
      %12 = vector.load %arg5[%c0_9, %c0_10] : memref<4x256xf32, #tpu.memory_space<vmem>>, vector<4x256xf32>
      tpu.vector_store %arg5[%c0_9, %c0_10], %11 {strides = array<i32>} : memref<4x256xf32, #tpu.memory_space<vmem>>, vector<4x256xf32>,
    } else {
    }
    %c0 = arith.constant 0 : index
    %c0_1 = arith.constant 0 : index
    %c0_2 = arith.constant 0 : index
    %3 = vector.load %arg3[%c0, %c0_1, %c0_2] : memref<1x4x256xf32, #tpu.memory_space<vmem>>, vector<1x4x256xf32>
    %4 = vector.shape_cast %3 : vector<1x4x256xf32> to vector<4x256xf32>
    %c0_3 = arith.constant 0 : index
    %c0_4 = arith.constant 0 : index
    %5 = vector.load %arg5[%c0_3, %c0_4] : memref<4x256xf32, #tpu.memory_space<vmem>>, vector<4x256xf32>
    %6 = arith.addf %5, %4 : vector<4x256xf32>
    %c0_5 = arith.constant 0 : index
    %c0_6 = arith.constant 0 : index
    %7 = vector.load %arg5[%c0_5, %c0_6] : memref<4x256xf32, #tpu.memory_space<vmem>>, vector<4x256xf32>
    tpu.vector_store %arg5[%c0_5, %c0_6], %6 {strides = array<i32>} : memref<4x256xf32, #tpu.memory_space<vmem>>, vector<4x256xf32>,
    %c0_i32_7 = arith.constant 0 : i32
    %8 = arith.cmpi eq, %arg2, %c0_i32_7 : i32
    %9 = arith.extui %8 : i1 to i32
    %c0_i32_8 = arith.constant 0 : i32
    %10 = arith.cmpi ne, %9, %c0_i32_8 : i32
    scf.if %10 {
      %c0_9 = arith.constant 0 : index
      %c0_10 = arith.constant 0 : index
      %11 = vector.load %arg5[%c0_9, %c0_10] : memref<4x256xf32, #tpu.memory_space<vmem>>, vector<4x256xf32>
      %cst = arith.constant dense<0.000000e+00> : vector<4xf32>
      %12 = vector.multi_reduction <add>, %11, %cst [1] : vector<4x256xf32> to vector<4xf32>
      %13 = vector.shape_cast %12 : vector<4xf32> to vector<4x1xf32>
      %c0_11 = arith.constant 0 : index
      %c0_12 = arith.constant 0 : index
      %c0_13 = arith.constant 0 : index
      %c0_14 = arith.constant 0 : index
      %14 = vector.load %arg4[%c0_11, %c0_12, %c0_13, %c0_14] : memref<1x1x4x1xf32, #tpu.memory_space<vmem>>, vector<1x1x4x1xf32>
      %15 = vector.shape_cast %14 : vector<1x1x4x1xf32> to vector<4x1xf32>
      %16 = vector.shape_cast %13 : vector<4x1xf32> to vector<1x1x4x1xf32>
      tpu.vector_store %arg4[%c0_11, %c0_12, %c0_13, %c0_14], %16 {strides = array<i32>} : memref<1x1x4x1xf32, #tpu.memory_space<vmem>>, vector<1x1x4x1xf32>,
    } else {
    }
    return
  }
  func.func @transform_0(%arg0: i32, %arg1: i32, %arg2: i32) -> (i32, i32, i32) {
    %c1_i32 = arith.constant 1 : i32
    %0 = arith.muli %arg1, %c1_i32 : i32
    %1 = arith.addi %0, %arg2 : i32
    %c0_i32 = arith.constant 0 : i32
    %2 = arith.minsi %1, %c0_i32 : i32
    %c0_i32_0 = arith.constant 0 : i32
    %c0_i32_1 = arith.constant 0 : i32
    return %arg0, %c0_i32_0, %2 : i32, i32, i32
  }
  func.func @transform_1(%arg0: i32, %arg1: i32, %arg2: i32) -> (i32, i32, i32, i32) {
    %c0_i32 = arith.constant 0 : i32
    %c0_i32_0 = arith.constant 0 : i32
    %c0_i32_1 = arith.constant 0 : i32
    return %arg0, %arg1, %c0_i32, %c0_i32_0 : i32, i32, i32, i32
  }
}

</mosaic_0001>

<bundles_post_ra>
// kernel: tpu_custom_call.1
= control target key start
LH: loop header
LB: loop body
LE: loop exit
PB: predicated region body
PF: predicated region fallthrough
CT: control target
= control target key end

     0   :  { %6 = vsyncpa [#allocation4], 0  ;;  %s577_s0 = inlined_call_operand.hbm [shape: f32[2,4,256], index: 0, kind: input, shape index: {}]   ;;  %s578_s1 = inlined_call_operand.vmem [shape: f32[2,1,4,1], index: 1, kind: output, shape index: {}]  }
   0x1   :  { %8 = vsyncpa [#allocation4 + $0x1], 0  ;;  %s452_s6 = smov 0   ;;  %s454_s7 = smov 0  }
   0x2   :  { %s456_s8 = smov 0   ;;  %s458_s9 = smov 0  }
   0x3   :  { %s460_s10 = smov 0   ;;  %s462_s11 = smov 0  }
   0x4 LB: > { %s290_s12 = sadd.s32 4294967295, %s439_s11   ;;  %s33_s13 = sadd.s32 1, %s435_s10  ;;  %s439_s11 = sphi %s462_s11, %s14_s11   ;;  %s435_s10 = sphi %s460_s10, %s588_s10   ;;  %s431_s9 = sphi %s458_s9, %s587_s9   ;;  %s427_s8 = sphi %s456_s8, %s586_s8   ;;  %s423_s7 = sphi %s454_s7, %s585_s7   ;;  %s419_s6 = sphi %s452_s6, %s584_s6  }
   0x5   : > { %p35_p0 = scmp.ge.s32.totalorder %s33_s13, 2  ;;  %s48_s14 = sadd.s32 1, %s427_s8 }
   0x6   : > { %p55_p1 = scmp.ne.s32.totalorder %s427_s8, %s423_s7  ;;  %p56_p2 = scmp.eq.s32.totalorder %s439_s11, 0 }
   0x7   : > { %s590_s13 = smov (%p35_p0, %s33_s13), 0  ;;  %p61_p4 = scmp.ne.s32.totalorder %s423_s7, %s419_s6 }
   0x8   : > { %p488_p3 = por %p56_p2, %p55_p1  ;;  %s43_s16 = ssub.s32 %s435_s10, %s590_s13 }
   0x9   : > { %p62_p5 = scmp.eq.s32.totalorder %s290_s12, 0  ;;  %p46_p6 = scmp.eq.s32.totalorder %s43_s16, 0 }
   0xa   : > { %p309_p8 = scmp.lt.s32.totalorder %s439_s11, 2  ;;  %s113_s19 = sand.u32 1, %s427_s8  }
   0xb   : > { %p495_p7 = por %p62_p5, %p61_p4  ;;  %s302_s20 = sshll.u32 %s435_s10, 7 }
   0xc   : > { %s501_s18 = scalar_select %p46_p6, %s427_s8, %s48_s14  }
   0xd   : > { %s294_s21 = sshll.u32 %s113_s19, 3  ;;  %s508_s24 = scalar_lea.hbm %s577_s0, %s302_s20 }
   0xe   : > { %s117_s25 = scalar_lea.vmem [#allocation3], %s294_s21  ;;  %p512_p9 = pnand %p309_p8, %p488_p3 }
   0xf   : > { %s130_s26 = sshll.u32 %s117_s25, 4  ;;  %s114_s28 = scalar_lea.sflag [#allocation4], %s113_s19  ;;  %s516_s26 = int_to_ptr.vmem [resolvable:$true] %s130_s26 }
  0x10   : > { %s359_s29 = scalar_lea.hbm %s508_s24, 128  ;;  %p361_p13 = pneg %p512_p9 }
  0x11   : > { %p360_p12 = scmp.ne.s32.totalorder %s508_s24, %s359_s29  ;;  %s364_s3 = scalar_lea.hbm %s577_s0, 256 }
  0x12   : > { %p365_p2 = scmp.lt.u32.totalorder %s508_s24, %s577_s0  ;;  %p366_p3 = scmp.lt.u32.totalorder %s364_s3, %s359_s29 }
  0x13   : > { %p362_p0 = pnand %p361_p13, %p360_p12  ;;  %p368_p5 = scmp.lt.u32.totalorder %s359_s29, %s508_s24 }
  0x14   : > { %p367_p4 = por %p366_p3, %p365_p2 }
  0x15   : > { %p363_p1 = pneg %p362_p0 }
  0x16   : > { %p369_p6 = por %p368_p5, %p367_p4 }
  0x18   : > { %p370_p8 = pnand %p369_p6, %p363_p1 }
  0x1a   : > { %373 = shalt.err (!%p370_p8)
}
  0x1b   : > { %s374_s6 = scalar_lea.vmem %s516_s26, 128  ;;  %s441_s12 = smov [#allocation3]  }
  0x1c   : > { %p375_p12 = scmp.ne.s32.totalorder %s516_s26, %s374_s6  ;;  %s379_s14 = sshll.u32 %s441_s12, 4  ;;  %s380_s14 = int_to_ptr.vmem [resolvable:$false] %s379_s14 }
  0x1d   : > { %s381_s15 = scalar_lea.vmem %s380_s14, 256  ;;  %p382_p11 = scmp.lt.s32.totalorder %s516_s26, %s380_s14 }
  0x1e   : > { %p377_p0 = pnand %p375_p12, %p361_p13  ;;  %p383_p2 = scmp.lt.s32.totalorder %s381_s15, %s374_s6 }
  0x20   : > { %p378_p10 = pneg %p377_p0  ;;  %p384_p3 = por %p383_p2, %p382_p11 }
  0x22   : > { %p385_p4 = pnand %p384_p3, %p378_p10 }
  0x24   : > { %388 = shalt.err (!%p385_p4)
}
  0x25   : > { %308 = dma.hbm_to_vmem [thread:$0]  (!%p512_p9), %s508_s24, 128, %s516_s26, %s114_s28  }
  0x26   : > { %p582_p1 = scmp.lt.s32.totalorder %s439_s11, 3  ;;  %p583_p5 = scmp.ge.s32.totalorder %s439_s11, 1 }
  0x28   : > { %p136_p13 = pnand %p583_p5, %p582_p1 }
  0x29   : > { %s141_s16 = sand.u32 (!%p136_p13), 1, %s423_s7  }
  0x2a   : > { %139 = sbr.rel (%p136_p13) target bundleno = 199 (0xc7), region = 24  ;;  %s298_s19 = sshll.u32 (!%p136_p13), %s141_s16, 3 }
  0x2b   : > { %s142_s20 = scalar_lea.sflag (!%p136_p13), [#allocation4], %s141_s16  ;;  %s145_s21 = scalar_lea.vmem (!%p136_p13), [#allocation3], %s298_s19 }
  0x31   : > { %414 = dma.done.wait (%p495_p7), %s142_s20, 128  }
  0x32   : > { %416 = vsyncadd (%p495_p7), %s142_s20, 4294967168  ;;  %vm193_vm0 = vcmask 1043456   ;;  %v182_v0 = vld [vmem:[%s145_s21] sm:$0xff]  ;;  %p170_p9 = scmp.lt.s32.totalorder %s431_s9, 1  ;;  %vm199_vm1 = vcmask 3072  }
  0x33   : > { %v191_v1 = vcombine.high %v182_v0, %v182_v0  ;;  %v194_v2 = vsel %vm193_vm0, %v182_v0, 0.0 }
  0x34   : > { %s592_s9 = smov (!%p170_p9, %s431_s9), 1 }
  0x35   : > { %v195_v3 = vsel %vm193_vm0, %v191_v1, 0.0  ;;  %s299_s22 = sshll.u32 %s592_s9, 2 }
  0x36   : > { %v196_v4 = vadd.f32 %v195_v3, %v194_v2  ;;  %s176_s25 = scalar_lea.vmem %s578_s1, %s299_s22 }
  0x38   : > { %197 = vadd.xlane.f32.xlu0 %v196_v4 }
  0xc5   : > { %v198_v5 = vpop.xlane.xlu0 %197 }
  0xc6   : > { %200 = vst.msk [vmem:[%s176_s25] sm:$0xf] %vm199_vm1, %v198_v5 }
  0xc7 PF: > { %s14_s11 = sadd.s32 1, %s439_s11   ;;  %s584_s6 = smov %s423_s7 }
  0xc8   : > { %p11_p7 = scmp.ge.s32.totalorder %s14_s11, 4   ;;  %s585_s7 = smov %s427_s8 }
  0xc9   : > { %s586_s8 = smov %s501_s18  ;;  %s587_s9 = smov %s435_s10 }
  0xca   : > { %s588_s10 = smov %s590_s13  ;;  %13 = sbr.rel (!%p11_p7) target bundleno = 4 (0x4), region = 72 }
  0xd1   :  { %226 = vsyncpa [#allocation4], 1 }
  0xd2   :  { %228 = vsyncpa [#allocation4 + $0x1], 1 }

</bundles_post_ra>
